<compile_context>
chip_gen: v5e
topology: v5e:2x2
jax: 0.10.0
libtpu: 0.0.40
codegen_flags: <defaults>
</compile_context>

<pallas_src>
import jax
import jax.numpy as jnp
from jax.experimental import pallas as pl
from jax.experimental.pallas import tpu as pltpu

_VMEM_LIMIT = 32 * 1024 * 1024  # safe scoped-VMEM ceiling on v5e/v6e/v7x


def _linear_small_kernel(x_ref, w_ref, b_ref, o_ref):
    """Grid-less path: whole problem resident in VMEM, exact f32 VPU math."""
    x = x_ref[...]                      # (B, F) VMEM
    w = w_ref[...]                      # (1, F) VMEM, broadcasts over rows
    b = b_ref[0]                        # scalar bias read from SMEM
    y = jnp.sum(x * w, axis=-1, keepdims=True) + b
    o_ref[...] = y.astype(o_ref.dtype)


def _make_tiled_kernel(valid_rows: int, block_rows: int):
    """Batch-tiled path: each grid step produces a lane-dense (1, tb) row."""

    def kernel(x_ref, w_ref, b_ref, o_ref):
        x = x_ref[...]                  # (tb, F) VMEM (auto double-buffered)
        w = w_ref[...]                  # (1, F) VMEM-resident, single copy
        b = b_ref[0]                    # scalar bias from SMEM
        # (1, F) . (tb, F)^T -> (1, tb) on the MXU.  Lane-dense result: 128
        # useful lanes per output vreg (~16x fewer stores than a (tb, 1)
        # block, no masked vst), no VPU broadcast-mul, no XLU cross-lane
        # reduce, no (tb,1)->(1,tb) relayout.  MXU slot is otherwise idle.
        y = jax.lax.dot_general(
            w, x,
            dimension_numbers=(((1,), (1,)), ((), ())),
            preferred_element_type=jnp.float32,
        ) + b
        if valid_rows % block_rows != 0:
            # Masked ragged tail: zero rows of the (padded) last block that
            # lie beyond the real batch, so the padded output is deterministic.
            row = (pl.program_id(0) * block_rows
                   + jax.lax.broadcasted_iota(jnp.int32, y.shape, 1))
            y = jnp.where(row < valid_rows, y, 0.0)
        o_ref[...] = y.astype(o_ref.dtype)

    return kernel


def linear_pallas(features, weight, bias, *, batch_tile=8192,
                  min_tiled_batch=None):
    """y = features @ weight.T + bias  (PyTorch nn.Linear(15, 1) semantics).

    features: [..., F]; weight: [1, F] (native PyTorch layout); bias: [1].
    """
    if min_tiled_batch is None:
        # Big enough that per-grid-step overhead is amortized and v7x's two
        # TensorCores each get >=1 tile; small enough that the grid-less path
        # below never holds more than ~17 MiB of 128-lane-padded rows in VMEM.
        min_tiled_batch = 2 * batch_tile
    assert batch_tile % 128 == 0, "batch_tile must be a multiple of 128"
    assert min_tiled_batch >= batch_tile

    *lead, F = features.shape
    Fout, Fw = weight.shape
    assert Fw == F, "weight feature dim mismatch"
    # TODO(synk): generalize to Fout > 1 if ever needed; the module fixes Fout=1.
    assert Fout == 1, "kernel is specialized to nn.Linear(..., 1)"
    assert bias.shape == (Fout,)

    x = features.reshape(-1, F)         # contiguous, free
    B = x.shape[0]
    out_lead_shape = tuple(lead) + (Fout,)

    if B >= min_tiled_batch:
        tb = batch_tile
        num_tiles = pl.cdiv(B, tb)
        padded_b = num_tiles * tb
        out = pl.pallas_call(
            _make_tiled_kernel(B, tb),
            out_shape=jax.ShapeDtypeStruct((1, padded_b), x.dtype),
            grid=(num_tiles,),
            in_specs=[
                # Row blocks of features stream through VMEM, double-buffered.
                pl.BlockSpec((tb, F), lambda i: (i, 0)),
                # Whole (1, F) weight stays resident in VMEM: no per-step DMA
                # and no pointless double-buffering of a 4 KiB tile.
                pl.BlockSpec(memory_space=pltpu.MemorySpace.VMEM),
                # Scalar bias in SMEM.
                pl.BlockSpec(memory_space=pltpu.MemorySpace.SMEM),
            ],
            # Lane-dense output: one (1, tb) row block per grid step.
            out_specs=pl.BlockSpec((1, tb), lambda i: (0, i)),
            compiler_params=pltpu.CompilerParams(
                dimension_semantics=("parallel",),  # v7x: both TCs split batch
                vmem_limit_bytes=_VMEM_LIMIT,
            ),
        )(x, weight, bias)
        # (1, padded_b) -> (B, 1): contiguous slice + reshape, no transpose.
        return out[0, :B].reshape(out_lead_shape)

    # Small-batch path: single grid-less invocation, whole arrays resident in
    # VMEM (bias in SMEM).  No per-grid-step overhead, exact f32 VPU math.
    out = pl.pallas_call(
        _linear_small_kernel,
        out_shape=jax.ShapeDtypeStruct((B, Fout), x.dtype),
        in_specs=[
            pl.BlockSpec(memory_space=pltpu.MemorySpace.VMEM),
            pl.BlockSpec(memory_space=pltpu.MemorySpace.VMEM),
            pl.BlockSpec(memory_space=pltpu.MemorySpace.SMEM),
        ],
        out_specs=pl.BlockSpec(memory_space=pltpu.MemorySpace.VMEM),
        compiler_params=pltpu.CompilerParams(vmem_limit_bytes=_VMEM_LIMIT),
    )(x, weight, bias)
    return out.reshape(out_lead_shape)


def _ref_linear(x, weight, bias):
    # Exact f32 reference (elementwise multiply + reduce; avoids XLA's
    # default-precision matmul so small-path comparisons can stay tight).
    return jnp.sum(x * weight[0][None, :], axis=-1, keepdims=True) + bias


if __name__ == "__main__":
    key = jax.random.PRNGKey(0)
    k_w, k_b, k_x1, k_x2, k_x3 = jax.random.split(key, 5)

    F, Fout = 15, 1
    # PyTorch nn.Linear default init: U(-1/sqrt(F), 1/sqrt(F)).
    bound = 1.0 / float(F) ** 0.5
    weight = jax.random.uniform(k_w, (Fout, F), jnp.float32, -bound, bound)
    bias = jax.random.uniform(k_b, (Fout,), jnp.float32, -bound, bound)

    # 1) Small batch (module-scale): grid-less path, exact f32.
    x1 = jax.random.normal(k_x1, (8, F), jnp.float32)
    y1 = jax.block_until_ready(linear_pallas(x1, weight, bias))
    assert y1.shape == (8, Fout)
    assert jnp.allclose(y1, _ref_linear(x1, weight, bias), atol=1e-5, rtol=1e-5)

    # 2) Mid batch: stays on the grid-less path (threshold raised per review).
    x2 = jax.random.normal(k_x2, (1024, F), jnp.float32)
    y2 = jax.block_until_ready(linear_pallas(x2, weight, bias))
    assert y2.shape == (1024, Fout)
    assert jnp.allclose(y2, _ref_linear(x2, weight, bias), atol=1e-5, rtol=1e-5)

    # 3) Tiled streaming path with a ragged tail, kept small for the test by
    #    overriding the tile knobs (5 grid steps, last one partial + masked).
    B3 = 4 * 512 + 37
    x3 = jax.random.normal(k_x3, (B3, F), jnp.float32)
    y3 = jax.block_until_ready(
        linear_pallas(x3, weight, bias, batch_tile=512, min_tiled_batch=1024))
    assert y3.shape == (B3, Fout)
    # Slightly looser tolerance: the tiled path contracts on the MXU, whose
    # f32 path may use rounded (bf16) passes depending on chip/compiler.
    assert jnp.allclose(y3, _ref_linear(x3, weight, bias), atol=5e-3, rtol=5e-3)

    print("KERNEL_OK")
</pallas_src>

<mosaic_0001>
module attributes {stable_mosaic.version = 11 : i64} {
  func.func @_linear_small_kernel(%arg0: memref<8x15xf32, #tpu.memory_space<vmem>>, %arg1: memref<1x15xf32, #tpu.memory_space<vmem>>, %arg2: memref<1xf32, #tpu.memory_space<smem>>, %arg3: memref<8x1xf32, #tpu.memory_space<vmem>>) attributes {dimension_semantics = [], scalar_prefetch = 0 : i64, scratch_operands = 0 : i64, tpu.core_type = #tpu.core_type<tc>} {
    %c0 = arith.constant 0 : index
    %c0_0 = arith.constant 0 : index
    %0 = vector.load %arg0[%c0, %c0_0] : memref<8x15xf32, #tpu.memory_space<vmem>>, vector<8x15xf32>
    %c0_1 = arith.constant 0 : index
    %c0_2 = arith.constant 0 : index
    %1 = vector.load %arg1[%c0_1, %c0_2] : memref<1x15xf32, #tpu.memory_space<vmem>>, vector<1x15xf32>
    %c0_3 = arith.constant 0 : index
    %2 = memref.load %arg2[%c0_3] : memref<1xf32, #tpu.memory_space<smem>>
    %3 = vector.broadcast %1 : vector<1x15xf32> to vector<8x15xf32>
    %4 = arith.mulf %0, %3 : vector<8x15xf32>
    %cst = arith.constant dense<0.000000e+00> : vector<8xf32>
    %5 = vector.multi_reduction <add>, %4, %cst [1] : vector<8x15xf32> to vector<8xf32>
    %6 = vector.shape_cast %5 : vector<8xf32> to vector<8x1xf32>
    %7 = vector.broadcast %2 : f32 to vector<8x1xf32>
    %8 = arith.addf %6, %7 : vector<8x1xf32>
    %c0_4 = arith.constant 0 : index
    %c0_5 = arith.constant 0 : index
    %9 = vector.load %arg3[%c0_4, %c0_5] : memref<8x1xf32, #tpu.memory_space<vmem>>, vector<8x1xf32>
    tpu.vector_store %arg3[%c0_4, %c0_5], %8 {strides = array<i32>} : memref<8x1xf32, #tpu.memory_space<vmem>>, vector<8x1xf32>,
    return
  }
}

</mosaic_0001>

<bundles_post_ra>
// kernel: tpu_custom_call.1
= control target key start
LH: loop header
LB: loop body
LE: loop exit
PB: predicated region body
PF: predicated region fallthrough
CT: control target
= control target key end

     0   :  { %9 = vsyncpa [#allocation4], 0  ;;  %s77_s15 = smov [#allocation3]   ;;  %s110_s0 = inlined_call_operand.hbm [shape: f32[8,15], index: 0, kind: input, shape index: {}]   ;;  %s111_s1 = inlined_call_operand.vmem [shape: f32[1,15], index: 1, kind: input, shape index: {}]   ;;  %s112_s2 = inlined_call_operand.<no memory space> [shape: f32[1], index: 2, kind: input, shape index: {}]   ;;  %s113_s3 = inlined_call_operand.vmem [shape: f32[8,1], index: 3, kind: output, shape index: {}]  }
   0x1   :  { %s15_s14 = sshll.u32 %s110_s0, 4  ;;  %s17_s16 = sshll.u32 %s77_s15, 4  ;;  %s16_s14 = int_to_ptr.hbm [resolvable:$true] %s15_s14  ;;  %s18_s16 = int_to_ptr.vmem [resolvable:$true] %s17_s16 }
   0x2   :  { %20 = dma.hbm_to_vmem [thread:$0]  %s16_s14, 128, %s18_s16, [#allocation4]  }
   0x3   :  { %75 = dma.done.wait [#allocation4], 128  }
   0x4   :  { %76 = vsyncadd [#allocation4], 4294967168  ;;  %v29_v0 = vld [vmem:[#allocation3] sm:$0xff]  ;;  %vm36_vm0 = vcmask 121856   ;;  %v40_v4 = vstv %s112_s2  ;;  %vm42_vm1 = vcmask 7168  }
   0x5   :  { %v50_v1 = vld [vmem:[%s111_s1] ss:$0 sm:$0xff] }
   0x6   :  { %v35_v2 = vmul.f32 %v50_v1, %v29_v0 }
   0x8   :  { %v37_v3 = vsel %vm36_vm0, %v35_v2, 0.0 }
   0x9   :  { %38 = vadd.xlane.f32.xlu0 %v37_v3 }
  0x7c   :  { %v39_v5 = vpop.xlane.xlu0 %38 }
  0x7d   :  { %v41_v6 = vadd.f32 %v40_v4, %v39_v5 }
  0x7f   :  { %43 = vst.msk [vmem:[%s113_s3] sm:$0xff] %vm42_vm1, %v41_v6 }
  0x80   :  { %48 = vsyncpa [#allocation4], 1 }

</bundles_post_ra>
